<compile_context>
chip_gen: v7x
topology: tpu7x:2x2x1
jax: 0.10.0
libtpu: 0.0.40
codegen_flags: <defaults>
</compile_context>

<pallas_src>
import jax
import jax.numpy as jnp
from jax.experimental import pallas as pl
from jax.experimental.pallas import tpu as pltpu


def _linear_relu_kernel(x_ref, w_ref, b_ref, o_ref):
    # x_ref: (TILE_B, F) VMEM, w_ref: (1, F) VMEM (resident), b_ref: (1,1) SMEM,
    # o_ref: (TILE_B, 1) VMEM.
    x = x_ref[...]                      # (TILE_B, F)
    w = w_ref[...]                      # (1, F) -> broadcasts over sublanes
    b = b_ref[0, 0]                     # scalar bias from SMEM
    # VPU multiply + XLU lane-reduce; no MXU involvement for the N=1 output.
    y = jnp.sum(x * w, axis=-1, keepdims=True) + b
    o_ref[...] = jnp.maximum(y, 0.0).astype(o_ref.dtype)


def linear_relu(x, w, b, *, tile_b=None):
    """x: (B, F) f32, w: (F, 1) f32, b: (1,) f32 -> (B, 1) f32."""
    B, F = x.shape
    w_row = w.reshape(1, F).astype(jnp.float32)
    b2d = b.reshape(1, 1).astype(jnp.float32)
    x = x.astype(jnp.float32)

    # Choose TILE_B: multiple of 8, input tile capped at ~2M f32 elements
    # (~8 MiB) so the double-buffered stream fits v7x's 32 MiB scoped VMEM
    # with plenty of headroom.
    if tile_b is None:
        max_tile_elems = 2 * 1024 * 1024
        tile_b = max(8, min(1024, (max_tile_elems // max(F, 1)) // 8 * 8))
    # Never exceed the (8-rounded) batch size.
    tile_b = min(tile_b, ((B + 7) // 8) * 8)

    grid_b = pl.cdiv(B, tile_b)
    b_pad = grid_b * tile_b
    if b_pad != B:
        # Zero-pad the batch; padded rows produce ReLU(bias) and are sliced off.
        x = jnp.pad(x, ((0, b_pad - B), (0, 0)))

    out = pl.pallas_call(
        _linear_relu_kernel,
        out_shape=jax.ShapeDtypeStruct((b_pad, 1), jnp.float32),
        grid_spec=pl.GridSpec(
            grid=(grid_b,),
            in_specs=[
                pl.BlockSpec((tile_b, F), lambda i: (i, 0)),          # x tile
                pl.BlockSpec((1, F), lambda i: (0, 0)),               # weight row (resident)
                pl.BlockSpec(memory_space=pltpu.MemorySpace.SMEM),    # bias scalar
            ],
            out_specs=pl.BlockSpec((tile_b, 1), lambda i: (i, 0)),
        ),
        compiler_params=pltpu.CompilerParams(
            dimension_semantics=("parallel",),
        ),
        cost_estimate=pl.CostEstimate(
            flops=2 * b_pad * F,
            transcendentals=0,
            bytes_accessed=4 * (b_pad * F + F + b_pad + 1),
        ),
    )(x, w_row, b2d)
    return out[:B]


if __name__ == "__main__":
    key = jax.random.PRNGKey(0)
    in_features = 32  # stand-in for all_features.shape[1]

    kx, kw, kb = jax.random.split(key, 3)

    # Deterministic parameter init (mimics nn.Linear uniform(-1/sqrt(F), 1/sqrt(F)))
    bound = 1.0 / jnp.sqrt(jnp.float32(in_features))
    w = jax.random.uniform(kw, (in_features, 1), minval=-bound, maxval=bound,
                           dtype=jnp.float32)
    bias = jax.random.uniform(kb, (1,), minval=-bound, maxval=bound,
                              dtype=jnp.float32)

    ok = True
    # Case 1: batch divisible by 8 (no padding path)
    B1 = 8
    x1 = jax.random.normal(kx, (B1, in_features), dtype=jnp.float32)
    out1 = jax.block_until_ready(linear_relu(x1, w, bias))
    ref1 = jnp.maximum(x1 @ w + bias, 0.0)
    ok &= out1.shape == (B1, 1)
    ok &= bool(jnp.allclose(out1, ref1, atol=1e-5, rtol=1e-5))

    # Case 2: ragged batch (exercises zero-pad + slice path)
    B2 = 13
    x2 = jax.random.normal(jax.random.fold_in(kx, 1), (B2, in_features),
                           dtype=jnp.float32)
    out2 = jax.block_until_ready(linear_relu(x2, w, bias))
    ref2 = jnp.maximum(x2 @ w + bias, 0.0)
    ok &= out2.shape == (B2, 1)
    ok &= bool(jnp.allclose(out2, ref2, atol=1e-5, rtol=1e-5))

    assert ok, "mismatch vs pure-JAX reference"
    print("KERNEL_OK")
</pallas_src>

<mosaic_0001>
module attributes {stable_mosaic.version = 11 : i64} {
  func.func @_linear_relu_kernel(%arg0: i32, %arg1: memref<8x32xf32, #tpu.memory_space<vmem>>, %arg2: memref<1x32xf32, #tpu.memory_space<vmem>>, %arg3: memref<1x1xf32, #tpu.memory_space<smem>>, %arg4: memref<8x1xf32, #tpu.memory_space<vmem>>) attributes {dimension_semantics = [#tpu.dimension_semantics<parallel>], iteration_bounds = array<i64: 1>, scalar_prefetch = 0 : i64, scratch_operands = 0 : i64, tpu.core_type = #tpu.core_type<tc>, window_params = [{transform_indices = @transform_0, window_bounds = array<i64: 8, 32>}, {pipeline_mode = #tpu.pipeline_mode<synchronous>, transform_indices = @transform_1, window_bounds = array<i64: 1, 32>}, {transform_indices = @transform_2, window_bounds = array<i64: 1, 1>}, {transform_indices = @transform_3, window_bounds = array<i64: 8, 1>}]} {
    %c0 = arith.constant 0 : index
    %c0_0 = arith.constant 0 : index
    %0 = vector.load %arg1[%c0, %c0_0] : memref<8x32xf32, #tpu.memory_space<vmem>>, vector<8x32xf32>
    %c0_1 = arith.constant 0 : index
    %c0_2 = arith.constant 0 : index
    %1 = vector.load %arg2[%c0_1, %c0_2] : memref<1x32xf32, #tpu.memory_space<vmem>>, vector<1x32xf32>
    %c0_3 = arith.constant 0 : index
    %c0_4 = arith.constant 0 : index
    %2 = memref.load %arg3[%c0_3, %c0_4] : memref<1x1xf32, #tpu.memory_space<smem>>
    %3 = vector.broadcast %1 : vector<1x32xf32> to vector<8x32xf32>
    %4 = arith.mulf %0, %3 : vector<8x32xf32>
    %cst = arith.constant dense<0.000000e+00> : vector<8xf32>
    %5 = vector.multi_reduction <add>, %4, %cst [1] : vector<8x32xf32> to vector<8xf32>
    %6 = vector.shape_cast %5 : vector<8xf32> to vector<8x1xf32>
    %7 = vector.broadcast %2 : f32 to vector<8x1xf32>
    %8 = arith.addf %6, %7 : vector<8x1xf32>
    %cst_5 = arith.constant 0.000000e+00 : f32
    %9 = vector.broadcast %cst_5 : f32 to vector<8x1xf32>
    %10 = arith.maximumf %8, %9 : vector<8x1xf32>
    %c0_6 = arith.constant 0 : index
    %c0_7 = arith.constant 0 : index
    %11 = vector.load %arg4[%c0_6, %c0_7] : memref<8x1xf32, #tpu.memory_space<vmem>>, vector<8x1xf32>
    tpu.vector_store %arg4[%c0_6, %c0_7], %10 {strides = array<i32>} : memref<8x1xf32, #tpu.memory_space<vmem>>, vector<8x1xf32>,
    return
  }
  func.func @transform_0(%arg0: i32) -> (i32, i32) {
    %c0_i32 = arith.constant 0 : i32
    %c0_i32_0 = arith.constant 0 : i32
    return %arg0, %c0_i32 : i32, i32
  }
  func.func @transform_1(%arg0: i32) -> (i32, i32) {
    %c0_i32 = arith.constant 0 : i32
    %c0_i32_0 = arith.constant 0 : i32
    %c0_i32_1 = arith.constant 0 : i32
    return %c0_i32, %c0_i32_0 : i32, i32
  }
  func.func @transform_2(%arg0: i32) -> (i32, i32) {
    %c0_i32 = arith.constant 0 : i32
    %c0_i32_0 = arith.constant 0 : i32
    %c0_i32_1 = arith.constant 0 : i32
    return %c0_i32, %c0_i32_0 : i32, i32
  }
  func.func @transform_3(%arg0: i32) -> (i32, i32) {
    %c0_i32 = arith.constant 0 : i32
    %c0_i32_0 = arith.constant 0 : i32
    return %arg0, %c0_i32 : i32, i32
  }
}

</mosaic_0001>

<bundles_post_ra>
// kernel: tpu_custom_call.1
= control target key start
LH: loop header
LB: loop body
LE: loop exit
PB: predicated region body
PF: predicated region fallthrough
CT: control target
= control target key end

     0   :  { %9 = vsyncpa [#allocation4], 0  ;;  %s77_s12 = smov [#allocation3]   ;;  %s119_s0 = inlined_call_operand.hbm [shape: f32[8,32], index: 0, kind: input, shape index: {}]   ;;  %s120_s1 = inlined_call_operand.vmem [shape: f32[1,32], index: 1, kind: input, shape index: {}]   ;;  %s121_s2 = inlined_call_operand.<no memory space> [shape: f32[1,1], index: 2, kind: input, shape index: {}]   ;;  %s122_s3 = inlined_call_operand.vmem [shape: f32[8,1], index: 3, kind: output, shape index: {}]  }
   0x1   :  { %s16_s13 = sshll.u32 %s77_s12, 4  ;;  %s53_s16 = scalar_lea.hbm %s119_s0, 128  ;;  %s17_s13 = int_to_ptr.vmem [resolvable:$true] %s16_s13 }
   0x2   :  { %p54_p0 = scmp.ne.s32.totalorder %s119_s0, %s53_s16  ;;  %p57_p1 = scmp.lt.u32.totalorder %s53_s16, %s119_s0 }
   0x4   :  { %p59_p2 = pnand %p57_p1, %p54_p0 }
   0x6   :  { %62 = shalt.err (!%p59_p2)
}
   0x7   :  { %s63_s21 = scalar_lea.vmem %s17_s13, 128  ;;  %p68_p4 = scmp.lt.s32.totalorder %s17_s13, %s17_s13 }
   0x8   :  { %p64_p3 = scmp.ne.s32.totalorder %s17_s13, %s63_s21  ;;  %p69_p5 = scmp.lt.s32.totalorder %s63_s21, %s63_s21 }
   0xa   :  { %p70_p6 = por %p69_p5, %p68_p4 }
   0xc   :  { %p71_p7 = pnand %p70_p6, %p64_p3 }
   0xe   :  { %74 = shalt.err (!%p71_p7)
}
   0xf   :  { %19 = dma.hbm_to_vmem [thread:$0]  %s119_s0, 128, %s17_s13, [#allocation4]  }
  0x10   :  { %75 = dma.done.wait [#allocation4], 128  }
  0x11   :  { %76 = vsyncadd [#allocation4], 4294967168  ;;  %v27_v0 = vld [vmem:[#allocation3] sm:$0xff]  ;;  %vm37_vm0 = vcmask 261120   ;;  %v41_v4 = vstv %s121_s2  ;;  %vm44_vm1 = vcmask 7168  }
  0x12   :  { %v51_v1 = vld [vmem:[%s120_s1] ss:$0 sm:$0xff] }
  0x13   :  { %v36_v2 = vmul.f32 %v51_v1, %v27_v0 }
  0x15   :  { %v38_v3 = vsel %vm37_vm0, %v36_v2, 0.0 }
  0x16   :  { %39 = vadd.xlane.f32.xlu0 %v38_v3 }
  0xa3   :  { %v40_v5 = vpop.xlane.xlu0 %39 }
  0xa4   :  { %v42_v6 = vadd.f32 %v41_v4, %v40_v5 }
  0xa6   :  { %v43_v7 = vmax.f32 %v42_v6, 0.0 }
  0xa8   :  { %45 = vst.msk [vmem:[%s122_s3] sm:$0xff] %vm44_vm1, %v43_v7 }
  0xa9   :  { %50 = vsyncpa [#allocation4], 1 }

</bundles_post_ra>
